<compile_context>
chip_gen: v5e
topology: v5e:2x2
jax: 0.10.0
libtpu: 0.0.40
codegen_flags: <defaults>
</compile_context>

<pallas_src>
import functools

import jax
import jax.numpy as jnp
from jax.experimental import pallas as pl
from jax.experimental.pallas import tpu as pltpu

IN_FEATURES = 5
OUT_FEATURES = 10

# Batch rows per grid step (multiple of 8 for the sublane axis).
DEFAULT_BLOCK_B = 16384


def _linear_kernel(x_ref, w_ref, b_ref, o_ref):
    """One batch tile of y = x @ W^T + b, entirely in the PyTorch layout.

    x_ref: (TB, IN)   rows = batch (sublanes), features on lanes
    w_ref: (IN, OUT)  transposed weight, resident across all grid steps
    b_ref: (1, OUT)   f32 bias (pre-cast in the wrapper)
    o_ref: (TB, OUT)  written straight into the (B, OUT) output --
                      no HBM transpose pass on either side of the kernel.
    """
    y = jnp.dot(x_ref[...], w_ref[...], preferred_element_type=jnp.float32)
    o_ref[...] = (y + b_ref[...]).astype(o_ref.dtype)


def _vmem_limit_bytes(tb: int) -> int:
    # Worst-case VMEM for the pipelined blocks: the narrow feature axis is
    # padded to the 128-lane tile, so the x (tb, 5) and y (tb, 10) f32 blocks
    # each cost up to ceil(tb/8)*8 * 128 * 4 bytes, double-buffered.
    rows = ((tb + 7) // 8) * 8
    per_block = rows * 128 * 4
    need = 4 * per_block                      # 2 x-buffers + 2 y-buffers
    return min(need + (8 << 20), 48 << 20)    # headroom; stay under v7x 64 MiB


def _linear_pallas(x, w_t, bias_f32, *, block_b):
    B, in_f = x.shape
    assert in_f == IN_FEATURES and w_t.shape == (IN_FEATURES, OUT_FEATURES)

    # Single full block for small B (block dims == array dims is always legal);
    # otherwise fixed tiles of block_b rows (multiple of 8), last tile partial.
    tb = B if B <= block_b else block_b
    grid = (pl.cdiv(B, tb),)

    cost = pl.CostEstimate(
        flops=2 * B * IN_FEATURES * OUT_FEATURES,
        transcendentals=0,
        bytes_accessed=4 * (B * IN_FEATURES + B * OUT_FEATURES
                            + IN_FEATURES * OUT_FEATURES + OUT_FEATURES),
    )

    return pl.pallas_call(
        _linear_kernel,
        out_shape=jax.ShapeDtypeStruct((B, OUT_FEATURES), x.dtype),
        grid_spec=pltpu.PrefetchScalarGridSpec(
            num_scalar_prefetch=0,
            grid=grid,
            in_specs=[
                # x streams along the batch axis; the feature axis is the full
                # array width (5), so no HBM-side transpose/copy is needed.
                pl.BlockSpec((tb, IN_FEATURES), lambda i: (i, 0)),
                # Weight / bias stay resident across all grid steps.
                pl.BlockSpec((IN_FEATURES, OUT_FEATURES), lambda i: (0, 0)),
                pl.BlockSpec((1, OUT_FEATURES), lambda i: (0, 0)),
            ],
            out_specs=pl.BlockSpec((tb, OUT_FEATURES), lambda i: (i, 0)),
        ),
        compiler_params=pltpu.CompilerParams(
            # Batch tiles are independent: lets v7x's two TensorCores take
            # alternate tiles; harmless no-op on single-TC v5e/v6e.  If v7x
            # profiling shows one core idle, switch to pltpu.CORE_PARALLEL.
            dimension_semantics=("parallel",),
            vmem_limit_bytes=_vmem_limit_bytes(tb),
        ),
        cost_estimate=cost,
    )(x, w_t, bias_f32)


@functools.partial(jax.jit, static_argnames=("block_b",))
def linear_forward(x, weight, bias, *, block_b=DEFAULT_BLOCK_B):
    """PyTorch nn.Linear(5, 10) semantics: x (B, 5) -> (B, 10)."""
    # Only the tiny (10, 5) weight is transposed here (constant-size); the big
    # x / y arrays are consumed / produced directly in (B, features) layout.
    w_t = weight.T.astype(jnp.float32)
    bias_f32 = bias.astype(jnp.float32).reshape(1, OUT_FEATURES)
    return _linear_pallas(x, w_t, bias_f32, block_b=block_b)


if __name__ == "__main__":
    key = jax.random.PRNGKey(0)
    kx, kw, kb, kx2 = jax.random.split(key, 4)

    # Deterministic parameter init (PyTorch default: U(-1/sqrt(in), 1/sqrt(in)))
    bound = 1.0 / (IN_FEATURES ** 0.5)
    weight = jax.random.uniform(
        kw, (OUT_FEATURES, IN_FEATURES), minval=-bound, maxval=bound,
        dtype=jnp.float32)
    bias = jax.random.uniform(
        kb, (OUT_FEATURES,), minval=-bound, maxval=bound, dtype=jnp.float32)

    # Small shape consistent with the module: batch=2, in_features=5.
    B = 2
    x = jax.random.normal(kx, (B, IN_FEATURES), dtype=jnp.float32)
    y = linear_forward(x, weight, bias)
    jax.block_until_ready(y)
    y_ref = x @ weight.T + bias
    assert y.shape == (B, OUT_FEATURES)
    assert jnp.allclose(y, y_ref, atol=1e-5, rtol=1e-5), "mismatch vs reference (B=2)"

    # Also exercise the tiled, pipelined path: 2 full 16384-row tiles plus a
    # ragged (masked) last tile.
    B2 = 40000
    x2 = jax.random.normal(kx2, (B2, IN_FEATURES), dtype=jnp.float32)
    y2 = linear_forward(x2, weight, bias)
    jax.block_until_ready(y2)
    y2_ref = x2 @ weight.T + bias
    assert jnp.allclose(y2, y2_ref, atol=1e-5, rtol=1e-5), "mismatch vs reference (B=40000)"

    print("KERNEL_OK")
</pallas_src>

<mosaic_0001>
module attributes {stable_mosaic.version = 11 : i64} {
  func.func @_linear_kernel(%arg0: i32, %arg1: memref<2x5xf32, #tpu.memory_space<vmem>>, %arg2: memref<5x10xf32, #tpu.memory_space<vmem>>, %arg3: memref<1x10xf32, #tpu.memory_space<vmem>>, %arg4: memref<2x10xf32, #tpu.memory_space<vmem>>) attributes {dimension_semantics = [#tpu.dimension_semantics<parallel>], iteration_bounds = array<i64: 1>, scalar_prefetch = 0 : i64, scratch_operands = 0 : i64, tpu.core_type = #tpu.core_type<tc>, window_params = [{transform_indices = @transform_0, window_bounds = array<i64: 2, 5>}, {pipeline_mode = #tpu.pipeline_mode<synchronous>, transform_indices = @transform_1, window_bounds = array<i64: 5, 10>}, {pipeline_mode = #tpu.pipeline_mode<synchronous>, transform_indices = @transform_2, window_bounds = array<i64: 1, 10>}, {transform_indices = @transform_3, window_bounds = array<i64: 2, 10>}]} {
    %c0 = arith.constant 0 : index
    %c0_0 = arith.constant 0 : index
    %0 = vector.load %arg1[%c0, %c0_0] : memref<2x5xf32, #tpu.memory_space<vmem>>, vector<2x5xf32>
    %c0_1 = arith.constant 0 : index
    %c0_2 = arith.constant 0 : index
    %1 = vector.load %arg2[%c0_1, %c0_2] : memref<5x10xf32, #tpu.memory_space<vmem>>, vector<5x10xf32>
    %cst = arith.constant dense<0.000000e+00> : vector<2x10xf32>
    %2 = tpu.matmul %0, %1, %cst {dimension_numbers = #tpu.dot_dimension_numbers<[1], [0], [0], [1], [0, 0, 1, 1], [], []>} : vector<2x5xf32>, vector<5x10xf32>, vector<2x10xf32> -> vector<2x10xf32>
    %c0_3 = arith.constant 0 : index
    %c0_4 = arith.constant 0 : index
    %3 = vector.load %arg3[%c0_3, %c0_4] : memref<1x10xf32, #tpu.memory_space<vmem>>, vector<1x10xf32>
    %4 = vector.broadcast %3 : vector<1x10xf32> to vector<2x10xf32>
    %5 = arith.addf %2, %4 : vector<2x10xf32>
    %c0_5 = arith.constant 0 : index
    %c0_6 = arith.constant 0 : index
    %6 = vector.load %arg4[%c0_5, %c0_6] : memref<2x10xf32, #tpu.memory_space<vmem>>, vector<2x10xf32>
    tpu.vector_store %arg4[%c0_5, %c0_6], %5 {strides = array<i32>} : memref<2x10xf32, #tpu.memory_space<vmem>>, vector<2x10xf32>,
    return
  }
  func.func @transform_0(%arg0: i32) -> (i32, i32) {
    %c0_i32 = arith.constant 0 : i32
    %c0_i32_0 = arith.constant 0 : i32
    return %arg0, %c0_i32 : i32, i32
  }
  func.func @transform_1(%arg0: i32) -> (i32, i32) {
    %c0_i32 = arith.constant 0 : i32
    %c0_i32_0 = arith.constant 0 : i32
    %c0_i32_1 = arith.constant 0 : i32
    return %c0_i32, %c0_i32_0 : i32, i32
  }
  func.func @transform_2(%arg0: i32) -> (i32, i32) {
    %c0_i32 = arith.constant 0 : i32
    %c0_i32_0 = arith.constant 0 : i32
    %c0_i32_1 = arith.constant 0 : i32
    return %c0_i32, %c0_i32_0 : i32, i32
  }
  func.func @transform_3(%arg0: i32) -> (i32, i32) {
    %c0_i32 = arith.constant 0 : i32
    %c0_i32_0 = arith.constant 0 : i32
    return %arg0, %c0_i32 : i32, i32
  }
}

</mosaic_0001>

<bundles_post_ra>
// kernel: linear_forward.1
= control target key start
LH: loop header
LB: loop body
LE: loop exit
PB: predicated region body
PF: predicated region fallthrough
CT: control target
= control target key end

     0   :  { %8 = vsyncpa [#allocation3], 0  ;;  %s216_s0 = inlined_call_operand.hbm [shape: f32[2,5], index: 0, kind: input, shape index: {}]   ;;  %s217_s1 = inlined_call_operand.hbm [shape: f32[5,10], index: 1, kind: input, shape index: {}]   ;;  %s218_s2 = inlined_call_operand.vmem [shape: f32[1,10], index: 2, kind: input, shape index: {}]   ;;  %s219_s3 = inlined_call_operand.hbm [shape: f32[2,10], index: 3, kind: output, shape index: {}]  }
   0x1   :  { %9 = vsyncpa [#allocation6], 0 }
   0x2   :  { %10 = vsyncpa [#allocation4], 0  ;;  %s16_s14 = sshll.u32 %s216_s0, 4  ;;  %s181_s15 = smov [#allocation2]   ;;  %s17_s14 = int_to_ptr.hbm [resolvable:$true] %s16_s14 }
   0x3   :  { %s18_s16 = sshll.u32 %s181_s15, 4  ;;  %s27_s19 = sshll.u32 %s217_s1, 4  ;;  %s19_s16 = int_to_ptr.vmem [resolvable:$true] %s18_s16  ;;  %s28_s19 = int_to_ptr.hbm [resolvable:$true] %s27_s19 }
   0x4   :  { %21 = dma.hbm_to_vmem [thread:$0]  %s17_s14, 32, %s19_s16, [#allocation3]  }
   0x5   :  { %s182_s20 = smov [#allocation5]  }
   0x6   :  { %s29_s21 = sshll.u32 %s182_s20, 4  ;;  %s30_s21 = int_to_ptr.vmem [resolvable:$true] %s29_s21 }
   0x7   :  { %32 = dma.hbm_to_vmem [thread:$0]  %s28_s19, 128, %s30_s21, [#allocation6]  }
   0x8   :  { %175 = dma.done.wait [#allocation3], 32  }
   0x9   :  { %176 = vsyncadd [#allocation3], 4294967264 }
   0xa   :  { %177 = dma.done.wait [#allocation6], 128  }
   0xb   :  { %178 = vsyncadd [#allocation6], 4294967168  ;;  %vm53_vm0 = vcmask 1044480   ;;  %vm49_vm1 = vcmask 39936   ;;  %v44_v0 = vld [vmem:[#allocation5] sm:$0x1f] }
   0xc   :  { %v43_v1 = vld [vmem:[#allocation2] sm:$0x3]  ;;  %97 = vmatpush.msk.msra.mxu0 %vm53_vm0, %v44_v0  ;;  %s183_s1 = smov [#allocation7]   ;;  %s86_s26 = sshll.u32 %s219_s3, 4  ;;  %vm77_vm2 = vcmask 74752   ;;  %s87_s26 = int_to_ptr.hbm [resolvable:$true] %s86_s26 }
   0xd   :  { %98 = vmatmul.msk.f32.vlgmr.msra.gmra.mxu0 %vm49_vm1, %v43_v1  ;;  %v102_v2 = vld [vmem:[%s218_s2] ss:$0 sm:$0xff]  ;;  %s84_s23 = sshll.u32 %s183_s1, 4  ;;  %s85_s23 = int_to_ptr.vmem [resolvable:$true] %s84_s23 }
  0x8a   :  { %v74_v3 = vpop.f32.mrf.mxu0 }
  0x8b   :  { %v75_v4 = vadd.f32 %v102_v2, %v74_v3 }
  0x8d   :  { %78 = vst.msk [vmem:[#allocation7] sm:$0x3] %vm77_vm2, %v75_v4 }
  0x8e   :  { %89 = dma.vmem_to_hbm [thread:$0]  %s85_s23, 32, %s87_s26, [#allocation4]  }
  0x8f   :  { %179 = dma.done.wait [#allocation4], 32  }
  0x90   :  { %180 = vsyncadd [#allocation4], 4294967264 }
  0x91   :  { %94 = vsyncpa [#allocation3], 1 }
  0x92   :  { %95 = vsyncpa [#allocation6], 1 }
  0x93   :  { %96 = vsyncpa [#allocation4], 1 }

</bundles_post_ra>
